<compile_context>
chip_gen: v7x
topology: tpu7x:2x2x1
jax: 0.10.0
libtpu: 0.0.40
codegen_flags: <defaults>
</compile_context>

<pallas_src>
import jax
import jax.numpy as jnp
from jax import lax
from jax.experimental import pallas as pl
from jax.experimental.pallas import tpu as pltpu

_LANE = 128
_SUBLANE = 8
_N_OUT = 8  # unique output streams (12 PyTorch returns alias down to 8)


def _round_up(v, m):
    return ((v + m - 1) // m) * m


def _tile_max_for_device():
    """Largest safe row-tile: 9 streams * 2 buffers * tile * 128 * 4 B of VMEM."""
    try:
        dev = jax.devices()[0]
        if dev.platform != "tpu":
            return 1024
        kind = dev.device_kind.lower()
    except Exception:
        return 1024
    # v5e and older: keep 1024 rows (9.4 MiB) under the 16 MiB default
    # scoped-VMEM limit.  v6e / v7x: 2048 rows (18.9 MiB) fits the 32 MiB
    # default scoped limit with no flag.
    for old in ("v2", "v3", "v4", "v5"):
        if old in kind:
            return 1024
    return 2048


def _pick_tile(rows, tile_max):
    """Row tile: multiple of 8, capped by VMEM, >= ~8 grid steps when large."""
    tile = max(512, _round_up(max(rows // 8, 1), _SUBLANE))  # keep >=8 steps
    tile = min(tile, tile_max)                               # VMEM cap
    tile = min(tile, _round_up(rows, _SUBLANE))              # don't exceed array
    return max(tile, _SUBLANE)


def _act_kernel(x_ref,
                gelu_e_ref, gelu_t_ref, lrelu_d_ref, lrelu_s_ref,
                relu_ref, mish_ref, hsig_ref, hswish_ref):
    # Cast on load (free) so bf16/f16 inputs compute in f32 without a
    # wrapper-side astype pass over HBM.
    x = x_ref[...].astype(jnp.float32)
    out_dt = gelu_e_ref.dtype

    # ---- GELU exact + tanh approximation on the original x ----
    inv_sqrt2 = 0.7071067811865476
    gelu_e_ref[...] = (0.5 * x * (1.0 + lax.erf(x * inv_sqrt2))).astype(out_dt)
    c = 0.7978845608028654  # sqrt(2/pi)
    gelu_t_ref[...] = (
        0.5 * x * (1.0 + jnp.tanh(c * (x + 0.044715 * x * x * x)))
    ).astype(out_dt)

    # ---- Shared sign split: relu + both leaky-relus from one max/min ----
    xr = jnp.maximum(x, 0.0)   # relu(x); also relu(leaky(x)) since leaky keeps sign
    xn = jnp.minimum(x, 0.0)   # negative part
    lrelu_d_ref[...] = (xr + 0.01 * xn).astype(out_dt)
    lrelu_s_ref[...] = (xr + 0.3933874983975471 * xn).astype(out_dt)
    relu_ref[...] = xr.astype(out_dt)

    # ---- mish(relu(x)) = xr * tanh(softplus(xr)) ----
    # tanh(softplus(t)) = ((1+e^t)^2 - 1) / ((1+e^t)^2 + 1); clamp the exp
    # argument (xr >= 0) at 20 where the factor is already 1.0 in f32.
    # Division replaced by an EUP approximate reciprocal (idle slot).
    e = jnp.exp(jnp.minimum(xr, 20.0))
    s = (1.0 + e) * (1.0 + e)
    mish_ref[...] = (xr * (s - 1.0) * pl.reciprocal(s + 1.0, approx=True)).astype(out_dt)

    # ---- hardsigmoid(relu(x)) : final value of the mutated x1 ----
    # xr >= 0 so xr/6 + 0.5 >= 0.5 -> lower clamp at 0 is a no-op.
    hs = jnp.minimum(xr * (1.0 / 6.0) + 0.5, 1.0)
    hsig_ref[...] = hs.astype(out_dt)

    # ---- hardswish(hardsigmoid(relu(x))) ----
    # hs in [0.5, 1] -> hs/6 + 0.5 in [0.583, 0.667]: inner clamp is a no-op.
    hswish_ref[...] = (hs * (hs * (1.0 / 6.0) + 0.5)).astype(out_dt)


def model_forward(x1):
    """x1: any-shape tensor -> 12 outputs, each with x1's shape/dtype."""
    orig_shape = x1.shape
    dtype = x1.dtype
    n = int(x1.size)

    # Lane-dense (rows, 128) view.  Fast path: n % 128 == 0 -> the reshape is
    # a free bitcast, no pad, no post-kernel trim.
    if n % _LANE == 0:
        padded = False
        rows = n // _LANE
        x2 = x1.reshape(rows, _LANE)
    else:
        padded = True
        rows = pl.cdiv(n, _LANE)
        x2 = jnp.pad(x1.reshape(-1), (0, rows * _LANE - n)).reshape(rows, _LANE)

    tile = _pick_tile(rows, _tile_max_for_device())
    spec = pl.BlockSpec((tile, _LANE), lambda i: (i, 0))
    out_shapes = tuple(
        jax.ShapeDtypeStruct((rows, _LANE), dtype) for _ in range(_N_OUT)
    )

    itemsize = jnp.dtype(dtype).itemsize
    cost = pl.CostEstimate(
        flops=60 * n,
        transcendentals=4 * n,             # erf, tanh, exp, reciprocal
        bytes_accessed=(1 + _N_OUT) * n * itemsize,
    )

    outs = pl.pallas_call(
        _act_kernel,
        out_shape=out_shapes,
        grid=(pl.cdiv(rows, tile),),
        in_specs=[spec],
        out_specs=tuple(spec for _ in range(_N_OUT)),
        compiler_params=pltpu.CompilerParams(
            dimension_semantics=("parallel",)),
        cost_estimate=cost,
    )(x2)

    if padded:
        def unflatten(a):
            return a.reshape(-1)[:n].reshape(orig_shape)
    else:
        def unflatten(a):
            return a.reshape(orig_shape)

    gelu_e, gelu_t, lrelu_d, lrelu_s, relu, mish, hsig, hswish = map(
        unflatten, outs)

    # Map 8 unique tensors onto the 12 PyTorch return values.  The in-place
    # chain (leaky_ -> relu_ -> hardsigmoid_) leaves x1 == hardsigmoid(relu(x)),
    # and v5/v7/v10 alias x1, so they all equal that final value; v6/v8/v9/v11
    # are snapshots taken along the chain.
    v0, v1, v2 = gelu_e, gelu_e, gelu_t
    v3, v4 = lrelu_d, lrelu_s
    v5, v6, v7 = hsig, relu, hsig
    v8, v9, v10, v11 = mish, hsig, hsig, hswish
    return (v0, v1, v2, v3, v4, v5, v6, v7, v8, v9, v10, v11)


if __name__ == "__main__":
    key = jax.random.PRNGKey(0)
    B, F = 8, 4  # module example is (1, 4); use a small batch of 8 rows
    x1 = jax.random.normal(key, (B, F), dtype=jnp.float32)

    outs = jax.jit(model_forward)(x1)
    outs = jax.block_until_ready(outs)

    assert len(outs) == 12
    for o in outs:
        assert o.shape == (B, F)
        assert o.dtype == jnp.float32

    # Light numerical sanity checks against pure-JAX references.
    xf = x1.astype(jnp.float32)
    ref_gelu = 0.5 * xf * (1.0 + lax.erf(xf / jnp.sqrt(2.0)))
    ref_relu = jnp.maximum(xf, 0.0)
    ref_hsig = jnp.clip(ref_relu / 6.0 + 0.5, 0.0, 1.0)
    ref_mish = ref_relu * jnp.tanh(jax.nn.softplus(ref_relu))
    ref_hsw = ref_hsig * jnp.clip(ref_hsig + 3.0, 0.0, 6.0) / 6.0
    assert jnp.allclose(outs[0], ref_gelu, atol=1e-5, rtol=1e-5)
    assert jnp.allclose(outs[6], ref_relu, atol=1e-6)
    assert jnp.allclose(outs[5], ref_hsig, atol=1e-6)
    assert jnp.allclose(outs[8], ref_mish, atol=1e-2, rtol=1e-2)  # approx rcp
    assert jnp.allclose(outs[11], ref_hsw, atol=1e-5)

    print("KERNEL_OK")
</pallas_src>

<mosaic_0001>
module attributes {stable_mosaic.version = 11 : i64} {
  func.func @_act_kernel(%arg0: i32, %arg1: memref<8x128xf32, #tpu.memory_space<vmem>>, %arg2: memref<8x128xf32, #tpu.memory_space<vmem>>, %arg3: memref<8x128xf32, #tpu.memory_space<vmem>>, %arg4: memref<8x128xf32, #tpu.memory_space<vmem>>, %arg5: memref<8x128xf32, #tpu.memory_space<vmem>>, %arg6: memref<8x128xf32, #tpu.memory_space<vmem>>, %arg7: memref<8x128xf32, #tpu.memory_space<vmem>>, %arg8: memref<8x128xf32, #tpu.memory_space<vmem>>, %arg9: memref<8x128xf32, #tpu.memory_space<vmem>>) attributes {dimension_semantics = [#tpu.dimension_semantics<parallel>], iteration_bounds = array<i64: 1>, scalar_prefetch = 0 : i64, scratch_operands = 0 : i64, tpu.core_type = #tpu.core_type<tc>, window_params = [{transform_indices = @transform_0, window_bounds = array<i64: 8, 128>}, {transform_indices = @transform_1, window_bounds = array<i64: 8, 128>}, {transform_indices = @transform_2, window_bounds = array<i64: 8, 128>}, {transform_indices = @transform_3, window_bounds = array<i64: 8, 128>}, {transform_indices = @transform_4, window_bounds = array<i64: 8, 128>}, {transform_indices = @transform_5, window_bounds = array<i64: 8, 128>}, {transform_indices = @transform_6, window_bounds = array<i64: 8, 128>}, {transform_indices = @transform_7, window_bounds = array<i64: 8, 128>}, {transform_indices = @transform_8, window_bounds = array<i64: 8, 128>}]} {
    %c0 = arith.constant 0 : index
    %c0_0 = arith.constant 0 : index
    %0 = vector.load %arg1[%c0, %c0_0] : memref<8x128xf32, #tpu.memory_space<vmem>>, vector<8x128xf32>
    %cst = arith.constant 5.000000e-01 : f32
    %1 = vector.broadcast %cst : f32 to vector<8x128xf32>
    %2 = arith.mulf %1, %0 : vector<8x128xf32>
    %cst_1 = arith.constant 0.707106769 : f32
    %3 = vector.broadcast %cst_1 : f32 to vector<8x128xf32>
    %4 = arith.mulf %0, %3 : vector<8x128xf32>
    %5 = math.erf %4 : vector<8x128xf32>
    %cst_2 = arith.constant 1.000000e+00 : f32
    %6 = vector.broadcast %cst_2 : f32 to vector<8x128xf32>
    %7 = arith.addf %6, %5 : vector<8x128xf32>
    %8 = arith.mulf %2, %7 : vector<8x128xf32>
    %c0_3 = arith.constant 0 : index
    %c0_4 = arith.constant 0 : index
    %9 = vector.load %arg2[%c0_3, %c0_4] : memref<8x128xf32, #tpu.memory_space<vmem>>, vector<8x128xf32>
    tpu.vector_store %arg2[%c0_3, %c0_4], %8 {strides = array<i32>} : memref<8x128xf32, #tpu.memory_space<vmem>>, vector<8x128xf32>,
    %cst_5 = arith.constant 5.000000e-01 : f32
    %10 = vector.broadcast %cst_5 : f32 to vector<8x128xf32>
    %11 = arith.mulf %10, %0 : vector<8x128xf32>
    %cst_6 = arith.constant 4.471500e-02 : f32
    %12 = vector.broadcast %cst_6 : f32 to vector<8x128xf32>
    %13 = arith.mulf %12, %0 : vector<8x128xf32>
    %14 = arith.mulf %13, %0 : vector<8x128xf32>
    %15 = arith.mulf %14, %0 : vector<8x128xf32>
    %16 = arith.addf %0, %15 : vector<8x128xf32>
    %cst_7 = arith.constant 0.797884583 : f32
    %17 = vector.broadcast %cst_7 : f32 to vector<8x128xf32>
    %18 = arith.mulf %17, %16 : vector<8x128xf32>
    %19 = math.tanh %18 : vector<8x128xf32>
    %cst_8 = arith.constant 1.000000e+00 : f32
    %20 = vector.broadcast %cst_8 : f32 to vector<8x128xf32>
    %21 = arith.addf %20, %19 : vector<8x128xf32>
    %22 = arith.mulf %11, %21 : vector<8x128xf32>
    %c0_9 = arith.constant 0 : index
    %c0_10 = arith.constant 0 : index
    %23 = vector.load %arg3[%c0_9, %c0_10] : memref<8x128xf32, #tpu.memory_space<vmem>>, vector<8x128xf32>
    tpu.vector_store %arg3[%c0_9, %c0_10], %22 {strides = array<i32>} : memref<8x128xf32, #tpu.memory_space<vmem>>, vector<8x128xf32>,
    %cst_11 = arith.constant 0.000000e+00 : f32
    %24 = vector.broadcast %cst_11 : f32 to vector<8x128xf32>
    %25 = arith.maximumf %0, %24 : vector<8x128xf32>
    %cst_12 = arith.constant 0.000000e+00 : f32
    %26 = vector.broadcast %cst_12 : f32 to vector<8x128xf32>
    %27 = arith.minimumf %0, %26 : vector<8x128xf32>
    %cst_13 = arith.constant 0.00999999977 : f32
    %28 = vector.broadcast %cst_13 : f32 to vector<8x128xf32>
    %29 = arith.mulf %28, %27 : vector<8x128xf32>
    %30 = arith.addf %25, %29 : vector<8x128xf32>
    %c0_14 = arith.constant 0 : index
    %c0_15 = arith.constant 0 : index
    %31 = vector.load %arg4[%c0_14, %c0_15] : memref<8x128xf32, #tpu.memory_space<vmem>>, vector<8x128xf32>
    tpu.vector_store %arg4[%c0_14, %c0_15], %30 {strides = array<i32>} : memref<8x128xf32, #tpu.memory_space<vmem>>, vector<8x128xf32>,
    %cst_16 = arith.constant 0.393387496 : f32
    %32 = vector.broadcast %cst_16 : f32 to vector<8x128xf32>
    %33 = arith.mulf %32, %27 : vector<8x128xf32>
    %34 = arith.addf %25, %33 : vector<8x128xf32>
    %c0_17 = arith.constant 0 : index
    %c0_18 = arith.constant 0 : index
    %35 = vector.load %arg5[%c0_17, %c0_18] : memref<8x128xf32, #tpu.memory_space<vmem>>, vector<8x128xf32>
    tpu.vector_store %arg5[%c0_17, %c0_18], %34 {strides = array<i32>} : memref<8x128xf32, #tpu.memory_space<vmem>>, vector<8x128xf32>,
    %c0_19 = arith.constant 0 : index
    %c0_20 = arith.constant 0 : index
    %36 = vector.load %arg6[%c0_19, %c0_20] : memref<8x128xf32, #tpu.memory_space<vmem>>, vector<8x128xf32>
    tpu.vector_store %arg6[%c0_19, %c0_20], %25 {strides = array<i32>} : memref<8x128xf32, #tpu.memory_space<vmem>>, vector<8x128xf32>,
    %cst_21 = arith.constant 2.000000e+01 : f32
    %37 = vector.broadcast %cst_21 : f32 to vector<8x128xf32>
    %38 = arith.minimumf %25, %37 : vector<8x128xf32>
    %39 = math.exp %38 : vector<8x128xf32>
    %cst_22 = arith.constant 1.000000e+00 : f32
    %40 = vector.broadcast %cst_22 : f32 to vector<8x128xf32>
    %41 = arith.addf %40, %39 : vector<8x128xf32>
    %cst_23 = arith.constant 1.000000e+00 : f32
    %42 = vector.broadcast %cst_23 : f32 to vector<8x128xf32>
    %43 = arith.addf %42, %39 : vector<8x128xf32>
    %44 = arith.mulf %41, %43 : vector<8x128xf32>
    %cst_24 = arith.constant 1.000000e+00 : f32
    %45 = vector.broadcast %cst_24 : f32 to vector<8x128xf32>
    %46 = arith.subf %44, %45 : vector<8x128xf32>
    %47 = arith.mulf %25, %46 : vector<8x128xf32>
    %cst_25 = arith.constant 1.000000e+00 : f32
    %48 = vector.broadcast %cst_25 : f32 to vector<8x128xf32>
    %49 = arith.addf %44, %48 : vector<8x128xf32>
    %50 = tpu.reciprocal %49 {approx = true} : vector<8x128xf32> -> vector<8x128xf32>
    %51 = arith.mulf %47, %50 : vector<8x128xf32>
    %c0_26 = arith.constant 0 : index
    %c0_27 = arith.constant 0 : index
    %52 = vector.load %arg7[%c0_26, %c0_27] : memref<8x128xf32, #tpu.memory_space<vmem>>, vector<8x128xf32>
    tpu.vector_store %arg7[%c0_26, %c0_27], %51 {strides = array<i32>} : memref<8x128xf32, #tpu.memory_space<vmem>>, vector<8x128xf32>,
    %cst_28 = arith.constant 0.166666672 : f32
    %53 = vector.broadcast %cst_28 : f32 to vector<8x128xf32>
    %54 = arith.mulf %25, %53 : vector<8x128xf32>
    %cst_29 = arith.constant 5.000000e-01 : f32
    %55 = vector.broadcast %cst_29 : f32 to vector<8x128xf32>
    %56 = arith.addf %54, %55 : vector<8x128xf32>
    %cst_30 = arith.constant 1.000000e+00 : f32
    %57 = vector.broadcast %cst_30 : f32 to vector<8x128xf32>
    %58 = arith.minimumf %56, %57 : vector<8x128xf32>
    %c0_31 = arith.constant 0 : index
    %c0_32 = arith.constant 0 : index
    %59 = vector.load %arg8[%c0_31, %c0_32] : memref<8x128xf32, #tpu.memory_space<vmem>>, vector<8x128xf32>
    tpu.vector_store %arg8[%c0_31, %c0_32], %58 {strides = array<i32>} : memref<8x128xf32, #tpu.memory_space<vmem>>, vector<8x128xf32>,
    %cst_33 = arith.constant 0.166666672 : f32
    %60 = vector.broadcast %cst_33 : f32 to vector<8x128xf32>
    %61 = arith.mulf %58, %60 : vector<8x128xf32>
    %cst_34 = arith.constant 5.000000e-01 : f32
    %62 = vector.broadcast %cst_34 : f32 to vector<8x128xf32>
    %63 = arith.addf %61, %62 : vector<8x128xf32>
    %64 = arith.mulf %58, %63 : vector<8x128xf32>
    %c0_35 = arith.constant 0 : index
    %c0_36 = arith.constant 0 : index
    %65 = vector.load %arg9[%c0_35, %c0_36] : memref<8x128xf32, #tpu.memory_space<vmem>>, vector<8x128xf32>
    tpu.vector_store %arg9[%c0_35, %c0_36], %64 {strides = array<i32>} : memref<8x128xf32, #tpu.memory_space<vmem>>, vector<8x128xf32>,
    return
  }
  func.func @transform_0(%arg0: i32) -> (i32, i32) {
    %c0_i32 = arith.constant 0 : i32
    %c0_i32_0 = arith.constant 0 : i32
    return %arg0, %c0_i32 : i32, i32
  }
  func.func @transform_1(%arg0: i32) -> (i32, i32) {
    %c0_i32 = arith.constant 0 : i32
    %c0_i32_0 = arith.constant 0 : i32
    return %arg0, %c0_i32 : i32, i32
  }
  func.func @transform_2(%arg0: i32) -> (i32, i32) {
    %c0_i32 = arith.constant 0 : i32
    %c0_i32_0 = arith.constant 0 : i32
    return %arg0, %c0_i32 : i32, i32
  }
  func.func @transform_3(%arg0: i32) -> (i32, i32) {
    %c0_i32 = arith.constant 0 : i32
    %c0_i32_0 = arith.constant 0 : i32
    return %arg0, %c0_i32 : i32, i32
  }
  func.func @transform_4(%arg0: i32) -> (i32, i32) {
    %c0_i32 = arith.constant 0 : i32
    %c0_i32_0 = arith.constant 0 : i32
    return %arg0, %c0_i32 : i32, i32
  }
  func.func @transform_5(%arg0: i32) -> (i32, i32) {
    %c0_i32 = arith.constant 0 : i32
    %c0_i32_0 = arith.constant 0 : i32
    return %arg0, %c0_i32 : i32, i32
  }
  func.func @transform_6(%arg0: i32) -> (i32, i32) {
    %c0_i32 = arith.constant 0 : i32
    %c0_i32_0 = arith.constant 0 : i32
    return %arg0, %c0_i32 : i32, i32
  }
  func.func @transform_7(%arg0: i32) -> (i32, i32) {
    %c0_i32 = arith.constant 0 : i32
    %c0_i32_0 = arith.constant 0 : i32
    return %arg0, %c0_i32 : i32, i32
  }
  func.func @transform_8(%arg0: i32) -> (i32, i32) {
    %c0_i32 = arith.constant 0 : i32
    %c0_i32_0 = arith.constant 0 : i32
    return %arg0, %c0_i32 : i32, i32
  }
}

</mosaic_0001>

<bundles_post_ra>
// kernel: model_forward.1
= control target key start
LH: loop header
LB: loop body
LE: loop exit
PB: predicated region body
PF: predicated region fallthrough
CT: control target
= control target key end

     0   :  { %s453_s0 = inlined_call_operand.vmem [shape: f32[1,128], index: 0, kind: input, shape index: {}]   ;;  %s454_s1 = inlined_call_operand.vmem [shape: f32[1,128], index: 1, kind: output, shape index: {0}]   ;;  %s455_s2 = inlined_call_operand.vmem [shape: f32[1,128], index: 2, kind: output, shape index: {1}]   ;;  %s456_s3 = inlined_call_operand.vmem [shape: f32[1,128], index: 3, kind: output, shape index: {2}]   ;;  %s457_s4 = inlined_call_operand.vmem [shape: f32[1,128], index: 4, kind: output, shape index: {3}]   ;;  %s458_s5 = inlined_call_operand.vmem [shape: f32[1,128], index: 5, kind: output, shape index: {4}]   ;;  %s459_s6 = inlined_call_operand.vmem [shape: f32[1,128], index: 6, kind: output, shape index: {5}]   ;;  %s460_s7 = inlined_call_operand.vmem [shape: f32[1,128], index: 7, kind: output, shape index: {6}]   ;;  %s461_s8 = inlined_call_operand.vmem [shape: f32[1,128], index: 8, kind: output, shape index: {7}]  }
   0x1   :  { %v16_v0 = vld [vmem:[%s453_s0] sm:$0xff] }
   0x2   :  { %v18_v1 = vmul.f32 0.70710677, %v16_v0  ;;  %v23_v2 = vmul.f32 0.044715, %v16_v0  ;;  %v32_v3 = vmax.f32 %v16_v0, 0.0  ;;  %v33_v4 = vmin.f32 %v16_v0, 0.0 }
   0x3   :  { %v17_v21 = vmul.f32 0.5, %v16_v0 }
   0x4   :  { %373 = verf.f32 %v18_v1  ;;  %v24_v5 = vmul.f32 %v23_v2, %v16_v0  ;;  %40 = vst [vmem:[#allocation6] sm:$0xff] %v32_v3  ;;  %v41_v6 = vmin.f32 %v32_v3, 20.0  ;;  %v52_v7 = vmul.f32 0.16666667, %v32_v3 }
   0x5   :  { %v34_v8 = vmul.f32 0.01, %v33_v4  ;;  %v37_v9 = vmul.f32 0.3933875, %v33_v4 }
   0x6   :  { %v25_v10 = vmul.f32 %v24_v5, %v16_v0  ;;  %v42_v11 = vmul.f32 1.442695, %v41_v6  ;;  %v53_v12 = vadd.f32 0.5, %v52_v7 }
   0x7   :  { %v35_v13 = vadd.f32 %v34_v8, %v32_v3  ;;  %v38_v14 = vadd.f32 %v37_v9, %v32_v3 }
   0x8   :  { %v26_v15 = vadd.f32 %v25_v10, %v16_v0  ;;  %375 = vpow2.f32 %v42_v11  ;;  %v54_v16 = vmin.f32 %v53_v12, 1.0 }
   0x9   :  { %36 = vst [vmem:[#allocation4] sm:$0xff] %v35_v13  ;;  %39 = vst [vmem:[#allocation5] sm:$0xff] %v38_v14 }
   0xa   :  { %v27_v17 = vmul.f32 0.7978846, %v26_v15  ;;  %55 = vst [vmem:[#allocation8] sm:$0xff] %v54_v16  ;;  %v56_v18 = vmul.f32 0.16666667, %v54_v16 }
   0xb   :  { %v209_v19 = vld [vmem:[#allocation6] sm:$0x1] }
   0xc   :  { %377 = vtanh.f32 %v27_v17  ;;  %v57_v20 = vadd.f32 0.5, %v56_v18  ;;  %210 = vst [vmem:[%s458_s5] sm:$0x1] %v209_v19 }
   0xe   :  { %v374_v22 = vpop.eup %373  ;;  %v58_v23 = vmul.f32 %v57_v20, %v54_v16 }
   0xf   :  { %v20_v24 = vadd.f32 1.0, %v374_v22 }
  0x10   :  { %59 = vst [vmem:[#allocation9] sm:$0xff] %v58_v23  ;;  %v143_v25 = vld [vmem:[#allocation4] sm:$0x1]  ;;  %v176_v26 = vld [vmem:[#allocation5] sm:$0x1] }
  0x11   :  { %v21_v27 = vmul.f32 %v20_v24, %v17_v21  ;;  %144 = vst [vmem:[%s456_s3] sm:$0x1] %v143_v25  ;;  %177 = vst [vmem:[%s457_s4] sm:$0x1] %v176_v26  ;;  %v275_v28 = vld [vmem:[#allocation8] sm:$0x1] }
  0x12   :  { %v376_v29 = vpop.eup %375  ;;  %276 = vst [vmem:[%s460_s7] sm:$0x1] %v275_v28 }
  0x13   :  { %22 = vst [vmem:[#allocation2] sm:$0xff] %v21_v27  ;;  %v44_v30 = vadd.f32 1.0, %v376_v29 }
  0x15   :  { %v45_v31 = vmul.f32 %v44_v30, %v44_v30 }
  0x16   :  { %v378_v32 = vpop.eup %377 }
  0x17   :  { %v29_v33 = vadd.f32 1.0, %v378_v32  ;;  %v48_v34 = vadd.f32 1.0, %v45_v31  ;;  %v308_v35 = vld [vmem:[#allocation9] sm:$0x1]  ;;  %v372_v38 = vadd.f32 -1.0, %v45_v31 }
  0x18   :  { %309 = vst [vmem:[%s461_s8] sm:$0x1] %v308_v35 }
  0x19   :  { %v30_v36 = vmul.f32 %v29_v33, %v17_v21  ;;  %379 = vrcp.f32 %v48_v34  ;;  %v47_v39 = vmul.f32 %v372_v38, %v32_v3 }
  0x1a   :  { %v77_v37 = vld [vmem:[#allocation2] sm:$0x1] }
  0x1b   :  { %31 = vst [vmem:[#allocation3] sm:$0xff] %v30_v36  ;;  %78 = vst [vmem:[%s454_s1] sm:$0x1] %v77_v37 }
  0x22   :  { %v110_v40 = vld [vmem:[#allocation3] sm:$0x1] }
  0x23   :  { %v380_v41 = vpop.eup %379  ;;  %111 = vst [vmem:[%s455_s2] sm:$0x1] %v110_v40 }
  0x24   :  { %v50_v42 = vmul.f32 %v380_v41, %v47_v39 }
  0x26   :  { %51 = vst [vmem:[#allocation7] sm:$0xff] %v50_v42 }
  0x2d   :  { %v242_v43 = vld [vmem:[#allocation7] sm:$0x1] }
  0x2e   :  { %243 = vst [vmem:[%s459_s6] sm:$0x1] %v242_v43 }

</bundles_post_ra>
